<compile_context>
chip_gen: v6e
topology: v6e:2x2x1
jax: 0.10.0
libtpu: 0.0.40
codegen_flags: <defaults>
</compile_context>

<pallas_src>
import functools

import jax
import jax.numpy as jnp
from jax import lax
from jax.experimental import pallas as pl
from jax.experimental.pallas import tpu as pltpu


# ----------------------------------------------------------------------------
# Fully fused kernel: one grid step handles B batch elements.
# ----------------------------------------------------------------------------
def _transporter_kernel(grids_ref, img_ref, wfp_ref, bfp_ref, wrf_ref, brf_ref,
                        out_ref, *, std, C, D, K, HW, B):
    ys = grids_ref[0:1, :]                       # (1, HW) y coordinate per pixel
    xs = grids_ref[1:2, :]                       # (1, HW) x coordinate per pixel
    inv_std2 = (1.0 / std) ** 2

    b_fp = bfp_ref[...]                          # (D+K, 1) fused feat+point bias
    b_rf = brf_ref[...]                          # (C, 1)   refine bias

    def one_image(b, carry):
        # (C, 2*HW): src pixels in lanes [:HW], tgt pixels in lanes [HW:].
        img = img_ref[b].astype(jnp.float32)

        # Fused feature-encoder + point-net 1x1 conv as C broadcast-FMAs on the
        # VPU (contraction dim is 3 -> degenerate for the MXU).
        y = b_fp + wfp_ref[0] * img[0:1, :]
        for c in range(1, C):
            y = y + wfp_ref[c] * img[c:c + 1, :]
        feat = jnp.maximum(y[:D, :], 0.0)        # (D, 2*HW) feature encoder
        logits = y[D:, :]                        # (K, 2*HW) point net

        def keypoint_gaussians(lo):
            # Per-branch spatial softmax moments -> keypoint mean -> gaussian
            # map, without materializing the normalized heatmap.
            lg = logits[:, lo:lo + HW]           # (K, HW), 128-aligned slice
            m = jnp.max(lg, axis=-1, keepdims=True)
            e = jnp.exp(lg - m)
            se = jnp.sum(e, axis=-1, keepdims=True)            # (K, 1)
            sey = jnp.sum(e * ys, axis=-1, keepdims=True)      # (K, 1)
            sex = jnp.sum(e * xs, axis=-1, keepdims=True)      # (K, 1)
            inv = pl.reciprocal(se, approx=True)               # EUP slot
            inv = inv * (2.0 - se * inv)         # one Newton step, (K,1) only
            mu_y = sey * inv
            mu_x = sex * inv
            dist = ((ys - mu_y) ** 2 + (xs - mu_x) ** 2) * inv_std2
            return jnp.exp(-dist)                # (K, HW)

        src_f = feat[:, :HW]
        tgt_f = feat[:, HW:]
        src_g = keypoint_gaussians(0)
        tgt_g = keypoint_gaussians(HW)

        # Vectorized transport recurrence (suffix products, K static):
        #   out = src_f * prod_k a_k + tgt_f * sum_k t_k * prod_{j>k} a_j
        a = (1.0 - src_g) * (1.0 - tgt_g)        # (K, HW)
        w_coef = tgt_g[K - 1:K, :]               # (1, HW)
        prod = a[K - 1:K, :]                     # (1, HW)
        for k in range(K - 2, -1, -1):
            w_coef = w_coef + tgt_g[k:k + 1, :] * prod
            prod = prod * a[k:k + 1, :]
        transported = src_f * prod + tgt_f * w_coef            # (D, HW)

        # Refine net (1x1 conv) as D broadcast-FMAs on the VPU.
        recon = b_rf + wrf_ref[0] * transported[0:1, :]
        for d in range(1, D):
            recon = recon + wrf_ref[d] * transported[d:d + 1, :]
        out_ref[b] = recon.astype(out_ref.dtype)
        return carry

    lax.fori_loop(0, B, one_image, 0, unroll=True)


def transporter_forward(source_images, target_images, params, *, std=0.1,
                        images_per_step=None):
    N, C, H, W = source_images.shape
    HW = H * W
    D = params["w_feat"].shape[1]
    K = params["w_point"].shape[1]

    if images_per_step is None:
        # Amortize per-step overhead for large batches while keeping >= 2 grid
        # steps so both v7x TensorCores stay busy (v5e/v6e: pure serial loop,
        # so bigger B is strictly better there too).
        images_per_step = max(1, min(8, N // 2))
    B = int(images_per_step)
    n_steps = -(-N // B)
    N_pad = n_steps * B

    # Lane-dense layout, src/tgt concatenated on the lane axis: one DMA and one
    # fused projection per image. Free reshapes only (no host transposes).
    src = source_images.reshape(N, C, HW)
    tgt = target_images.reshape(N, C, HW)
    images = jnp.concatenate([src, tgt], axis=-1)              # (N, C, 2*HW)
    if N_pad != N:
        images = jnp.pad(images, ((0, N_pad - N), (0, 0), (0, 0)))

    # Per-input-channel columns of fused output coefficients (feature encoder
    # rows [:D], point-net rows [D:]) -> (C, D+K, 1) so the kernel reads a
    # clean (D+K, 1) column per channel (no lane slicing).
    w_fp = jnp.concatenate([params["w_feat"], params["w_point"]], axis=1)   # (C, D+K)
    w_fp = w_fp.reshape(C, D + K, 1).astype(jnp.float32)
    b_fp = jnp.concatenate([params["b_feat"], params["b_point"]]
                           ).reshape(D + K, 1).astype(jnp.float32)
    w_rf = params["w_refine"].reshape(D, C, 1).astype(jnp.float32)          # (D, C, 1)
    b_rf = params["b_refine"].reshape(C, 1).astype(jnp.float32)

    # Precomputed coordinate grids flattened to H*W (row 0: y, row 1: x).
    lin_y = jnp.linspace(-1.0, 1.0, H, dtype=jnp.float32)
    lin_x = jnp.linspace(-1.0, 1.0, W, dtype=jnp.float32)
    grids = jnp.stack([jnp.repeat(lin_y, W), jnp.tile(lin_x, H)])           # (2, HW)

    kern = functools.partial(_transporter_kernel, std=std, C=C, D=D, K=K,
                             HW=HW, B=B)
    out = pl.pallas_call(
        kern,
        out_shape=jax.ShapeDtypeStruct((N_pad, C, HW), source_images.dtype),
        grid=(n_steps,),
        in_specs=[
            pl.BlockSpec((2, HW), lambda g: (0, 0)),            # coord grids
            pl.BlockSpec((B, C, 2 * HW), lambda g: (g, 0, 0)),  # src|tgt images
            pl.BlockSpec((C, D + K, 1), lambda g: (0, 0, 0)),   # fused feat+point W
            pl.BlockSpec((D + K, 1), lambda g: (0, 0)),         # fused bias
            pl.BlockSpec((D, C, 1), lambda g: (0, 0, 0)),       # refine W
            pl.BlockSpec((C, 1), lambda g: (0, 0)),             # refine bias
        ],
        out_specs=pl.BlockSpec((B, C, HW), lambda g: (g, 0, 0)),
        compiler_params=pltpu.CompilerParams(
            dimension_semantics=("parallel",),
        ),
    )(grids, images, w_fp, b_fp, w_rf, b_rf)
    return out[:N].reshape(N, C, H, W)


# ----------------------------------------------------------------------------
# Pure-JAX reference (mirrors the PyTorch module) for a correctness check.
# ----------------------------------------------------------------------------
def _reference_forward(src, tgt, params, *, std):
    def conv(x, w, b, relu=False):
        y = jnp.einsum("nchw,cd->ndhw", x, w) + b[None, :, None, None]
        return jnp.maximum(y, 0.0) if relu else y

    def gaussian(logits):
        n, k, h, w = logits.shape
        heat = jax.nn.softmax(logits.reshape(n, k, h * w), axis=-1).reshape(n, k, h, w)
        lin_y = jnp.linspace(-1.0, 1.0, h, dtype=jnp.float32)
        lin_x = jnp.linspace(-1.0, 1.0, w, dtype=jnp.float32)
        mu_y = jnp.sum(heat * lin_y[None, None, :, None], axis=(-2, -1))
        mu_x = jnp.sum(heat * lin_x[None, None, None, :], axis=(-2, -1))
        dy = (lin_y[None, None, :, None] - mu_y[..., None, None]) ** 2
        dx = (lin_x[None, None, None, :] - mu_x[..., None, None]) ** 2
        return jnp.exp(-(dy + dx) / std ** 2)

    src_f = conv(src, params["w_feat"], params["b_feat"], relu=True)
    tgt_f = conv(tgt, params["w_feat"], params["b_feat"], relu=True)
    src_g = gaussian(conv(src, params["w_point"], params["b_point"]))
    tgt_g = gaussian(conv(tgt, params["w_point"], params["b_point"]))
    out = src_f
    for k in range(src_g.shape[1]):
        s = src_g[:, k:k + 1]
        t = tgt_g[:, k:k + 1]
        out = (1.0 - s) * (1.0 - t) * out + t * tgt_f
    return conv(out, params["w_refine"], params["b_refine"])


def make_params(key, c_in, n_feat, n_kpts):
    ks = jax.random.split(key, 6)
    return {
        "w_feat":   0.1 * jax.random.normal(ks[0], (c_in, n_feat), jnp.float32),
        "b_feat":   0.1 * jax.random.normal(ks[1], (n_feat,), jnp.float32),
        "w_point":  0.1 * jax.random.normal(ks[2], (c_in, n_kpts), jnp.float32),
        "b_point":  0.1 * jax.random.normal(ks[3], (n_kpts,), jnp.float32),
        "w_refine": 0.1 * jax.random.normal(ks[4], (n_feat, c_in), jnp.float32),
        "b_refine": 0.1 * jax.random.normal(ks[5], (c_in,), jnp.float32),
    }


if __name__ == "__main__":
    N, C, H, W = 2, 3, 16, 16     # batch, image channels, spatial
    K, D = 4, 8                   # keypoints, feature channels

    key = jax.random.PRNGKey(0)
    k_src, k_tgt, k_par = jax.random.split(key, 3)
    source_images = jax.random.normal(k_src, (N, C, H, W), jnp.float32)
    target_images = jax.random.normal(k_tgt, (N, C, H, W), jnp.float32)
    params = make_params(k_par, C, D, K)

    recon = jax.jit(functools.partial(transporter_forward, std=0.1))(
        source_images, target_images, params)
    jax.block_until_ready(recon)
    assert recon.shape == (N, C, H, W)

    ref = _reference_forward(source_images, target_images, params, std=0.1)
    max_err = float(jnp.max(jnp.abs(recon - ref)))
    assert max_err < 1e-3, f"mismatch vs reference: {max_err}"

    print("KERNEL_OK")
</pallas_src>

<mosaic_0001>
module attributes {stable_mosaic.version = 11 : i64} {
  func.func @_transporter_kernel(%arg0: i32, %arg1: memref<2x256xf32, #tpu.memory_space<vmem>>, %arg2: memref<1x3x512xf32, #tpu.memory_space<vmem>>, %arg3: memref<3x12x1xf32, #tpu.memory_space<vmem>>, %arg4: memref<12x1xf32, #tpu.memory_space<vmem>>, %arg5: memref<8x3x1xf32, #tpu.memory_space<vmem>>, %arg6: memref<3x1xf32, #tpu.memory_space<vmem>>, %arg7: memref<1x3x256xf32, #tpu.memory_space<vmem>>) attributes {dimension_semantics = [#tpu.dimension_semantics<parallel>], iteration_bounds = array<i64: 2>, scalar_prefetch = 0 : i64, scratch_operands = 0 : i64, tpu.core_type = #tpu.core_type<tc>, window_params = [{pipeline_mode = #tpu.pipeline_mode<synchronous>, transform_indices = @transform_0, window_bounds = array<i64: 2, 256>}, {transform_indices = @transform_1, window_bounds = array<i64: 1, 3, 512>}, {pipeline_mode = #tpu.pipeline_mode<synchronous>, transform_indices = @transform_2, window_bounds = array<i64: 3, 12, 1>}, {pipeline_mode = #tpu.pipeline_mode<synchronous>, transform_indices = @transform_3, window_bounds = array<i64: 12, 1>}, {pipeline_mode = #tpu.pipeline_mode<synchronous>, transform_indices = @transform_4, window_bounds = array<i64: 8, 3, 1>}, {pipeline_mode = #tpu.pipeline_mode<synchronous>, transform_indices = @transform_5, window_bounds = array<i64: 3, 1>}, {transform_indices = @transform_6, window_bounds = array<i64: 1, 3, 256>}]} {
    %c0 = arith.constant 0 : index
    %c0_0 = arith.constant 0 : index
    %0 = vector.load %arg1[%c0, %c0_0] : memref<2x256xf32, #tpu.memory_space<vmem>>, vector<1x256xf32>
    %c1 = arith.constant 1 : index
    %c0_1 = arith.constant 0 : index
    %1 = vector.load %arg1[%c1, %c0_1] : memref<2x256xf32, #tpu.memory_space<vmem>>, vector<1x256xf32>
    %c0_2 = arith.constant 0 : index
    %c0_3 = arith.constant 0 : index
    %2 = vector.load %arg4[%c0_2, %c0_3] : memref<12x1xf32, #tpu.memory_space<vmem>>, vector<12x1xf32>
    %c0_4 = arith.constant 0 : index
    %c0_5 = arith.constant 0 : index
    %3 = vector.load %arg6[%c0_4, %c0_5] : memref<3x1xf32, #tpu.memory_space<vmem>>, vector<3x1xf32>
    %c0_i32 = arith.constant 0 : i32
    %4 = arith.index_cast %c0_i32 : i32 to index
    %c0_6 = arith.constant 0 : index
    %c0_7 = arith.constant 0 : index
    %5 = vector.load %arg2[%4, %c0_6, %c0_7] : memref<1x3x512xf32, #tpu.memory_space<vmem>>, vector<1x3x512xf32>
    %6 = vector.shape_cast %5 : vector<1x3x512xf32> to vector<3x512xf32>
    %c0_8 = arith.constant 0 : index
    %c0_9 = arith.constant 0 : index
    %c0_10 = arith.constant 0 : index
    %7 = vector.load %arg3[%c0_8, %c0_9, %c0_10] : memref<3x12x1xf32, #tpu.memory_space<vmem>>, vector<1x12x1xf32>
    %8 = vector.shape_cast %7 : vector<1x12x1xf32> to vector<12x1xf32>
    %9 = vector.extract_strided_slice %6 {offsets = [0, 0], sizes = [1, 512], strides = [1, 1]} : vector<3x512xf32> to vector<1x512xf32>
    %10 = vector.broadcast %8 : vector<12x1xf32> to vector<12x512xf32>
    %11 = vector.broadcast %9 : vector<1x512xf32> to vector<12x512xf32>
    %12 = arith.mulf %10, %11 : vector<12x512xf32>
    %13 = vector.broadcast %2 : vector<12x1xf32> to vector<12x512xf32>
    %14 = arith.addf %13, %12 : vector<12x512xf32>
    %c1_11 = arith.constant 1 : index
    %c0_12 = arith.constant 0 : index
    %c0_13 = arith.constant 0 : index
    %15 = vector.load %arg3[%c1_11, %c0_12, %c0_13] : memref<3x12x1xf32, #tpu.memory_space<vmem>>, vector<1x12x1xf32>
    %16 = vector.shape_cast %15 : vector<1x12x1xf32> to vector<12x1xf32>
    %17 = vector.extract_strided_slice %6 {offsets = [1, 0], sizes = [1, 512], strides = [1, 1]} : vector<3x512xf32> to vector<1x512xf32>
    %18 = vector.broadcast %16 : vector<12x1xf32> to vector<12x512xf32>
    %19 = vector.broadcast %17 : vector<1x512xf32> to vector<12x512xf32>
    %20 = arith.mulf %18, %19 : vector<12x512xf32>
    %21 = arith.addf %14, %20 : vector<12x512xf32>
    %c2 = arith.constant 2 : index
    %c0_14 = arith.constant 0 : index
    %c0_15 = arith.constant 0 : index
    %22 = vector.load %arg3[%c2, %c0_14, %c0_15] : memref<3x12x1xf32, #tpu.memory_space<vmem>>, vector<1x12x1xf32>
    %23 = vector.shape_cast %22 : vector<1x12x1xf32> to vector<12x1xf32>
    %24 = vector.extract_strided_slice %6 {offsets = [2, 0], sizes = [1, 512], strides = [1, 1]} : vector<3x512xf32> to vector<1x512xf32>
    %25 = vector.broadcast %23 : vector<12x1xf32> to vector<12x512xf32>
    %26 = vector.broadcast %24 : vector<1x512xf32> to vector<12x512xf32>
    %27 = arith.mulf %25, %26 : vector<12x512xf32>
    %28 = arith.addf %21, %27 : vector<12x512xf32>
    %29 = vector.extract_strided_slice %28 {offsets = [0, 0], sizes = [8, 512], strides = [1, 1]} : vector<12x512xf32> to vector<8x512xf32>
    %cst = arith.constant 0.000000e+00 : f32
    %30 = vector.broadcast %cst : f32 to vector<8x512xf32>
    %31 = arith.maximumf %29, %30 : vector<8x512xf32>
    %32 = vector.extract_strided_slice %28 {offsets = [8, 0], sizes = [4, 512], strides = [1, 1]} : vector<12x512xf32> to vector<4x512xf32>
    %33 = vector.extract_strided_slice %31 {offsets = [0, 0], sizes = [8, 256], strides = [1, 1]} : vector<8x512xf32> to vector<8x256xf32>
    %34 = vector.extract_strided_slice %31 {offsets = [0, 256], sizes = [8, 256], strides = [1, 1]} : vector<8x512xf32> to vector<8x256xf32>
    %35 = vector.extract_strided_slice %32 {offsets = [0, 0], sizes = [4, 256], strides = [1, 1]} : vector<4x512xf32> to vector<4x256xf32>
    %cst_16 = arith.constant dense<0xFF800000> : vector<4xf32>
    %36 = vector.multi_reduction <maximumf>, %35, %cst_16 [1] : vector<4x256xf32> to vector<4xf32>
    %37 = vector.shape_cast %36 : vector<4xf32> to vector<4x1xf32>
    %38 = vector.broadcast %37 : vector<4x1xf32> to vector<4x256xf32>
    %39 = arith.subf %35, %38 : vector<4x256xf32>
    %40 = math.exp %39 : vector<4x256xf32>
    %cst_17 = arith.constant dense<0.000000e+00> : vector<4xf32>
    %41 = vector.multi_reduction <add>, %40, %cst_17 [1] : vector<4x256xf32> to vector<4xf32>
    %42 = vector.shape_cast %41 : vector<4xf32> to vector<4x1xf32>
    %43 = vector.broadcast %0 : vector<1x256xf32> to vector<4x256xf32>
    %44 = arith.mulf %40, %43 : vector<4x256xf32>
    %cst_18 = arith.constant dense<0.000000e+00> : vector<4xf32>
    %45 = vector.multi_reduction <add>, %44, %cst_18 [1] : vector<4x256xf32> to vector<4xf32>
    %46 = vector.shape_cast %45 : vector<4xf32> to vector<4x1xf32>
    %47 = vector.broadcast %1 : vector<1x256xf32> to vector<4x256xf32>
    %48 = arith.mulf %40, %47 : vector<4x256xf32>
    %cst_19 = arith.constant dense<0.000000e+00> : vector<4xf32>
    %49 = vector.multi_reduction <add>, %48, %cst_19 [1] : vector<4x256xf32> to vector<4xf32>
    %50 = vector.shape_cast %49 : vector<4xf32> to vector<4x1xf32>
    %51 = tpu.reciprocal %42 {approx = true} : vector<4x1xf32> -> vector<4x1xf32>
    %52 = arith.mulf %42, %51 : vector<4x1xf32>
    %cst_20 = arith.constant 2.000000e+00 : f32
    %53 = vector.broadcast %cst_20 : f32 to vector<4x1xf32>
    %54 = arith.subf %53, %52 : vector<4x1xf32>
    %55 = arith.mulf %51, %54 : vector<4x1xf32>
    %56 = arith.mulf %46, %55 : vector<4x1xf32>
    %57 = arith.mulf %50, %55 : vector<4x1xf32>
    %58 = vector.broadcast %0 : vector<1x256xf32> to vector<4x256xf32>
    %59 = vector.broadcast %56 : vector<4x1xf32> to vector<4x256xf32>
    %60 = arith.subf %58, %59 : vector<4x256xf32>
    %61 = arith.mulf %60, %60 : vector<4x256xf32>
    %62 = vector.broadcast %1 : vector<1x256xf32> to vector<4x256xf32>
    %63 = vector.broadcast %57 : vector<4x1xf32> to vector<4x256xf32>
    %64 = arith.subf %62, %63 : vector<4x256xf32>
    %65 = arith.mulf %64, %64 : vector<4x256xf32>
    %66 = arith.addf %61, %65 : vector<4x256xf32>
    %cst_21 = arith.constant 1.000000e+02 : f32
    %67 = vector.broadcast %cst_21 : f32 to vector<4x256xf32>
    %68 = arith.mulf %66, %67 : vector<4x256xf32>
    %cst_22 = arith.constant 0.000000e+00 : f32
    %69 = vector.broadcast %cst_22 : f32 to vector<4x256xf32>
    %70 = arith.subf %69, %68 : vector<4x256xf32>
    %71 = math.exp %70 : vector<4x256xf32>
    %72 = vector.extract_strided_slice %32 {offsets = [0, 256], sizes = [4, 256], strides = [1, 1]} : vector<4x512xf32> to vector<4x256xf32>
    %cst_23 = arith.constant dense<0xFF800000> : vector<4xf32>
    %73 = vector.multi_reduction <maximumf>, %72, %cst_23 [1] : vector<4x256xf32> to vector<4xf32>
    %74 = vector.shape_cast %73 : vector<4xf32> to vector<4x1xf32>
    %75 = vector.broadcast %74 : vector<4x1xf32> to vector<4x256xf32>
    %76 = arith.subf %72, %75 : vector<4x256xf32>
    %77 = math.exp %76 : vector<4x256xf32>
    %cst_24 = arith.constant dense<0.000000e+00> : vector<4xf32>
    %78 = vector.multi_reduction <add>, %77, %cst_24 [1] : vector<4x256xf32> to vector<4xf32>
    %79 = vector.shape_cast %78 : vector<4xf32> to vector<4x1xf32>
    %80 = vector.broadcast %0 : vector<1x256xf32> to vector<4x256xf32>
    %81 = arith.mulf %77, %80 : vector<4x256xf32>
    %cst_25 = arith.constant dense<0.000000e+00> : vector<4xf32>
    %82 = vector.multi_reduction <add>, %81, %cst_25 [1] : vector<4x256xf32> to vector<4xf32>
    %83 = vector.shape_cast %82 : vector<4xf32> to vector<4x1xf32>
    %84 = vector.broadcast %1 : vector<1x256xf32> to vector<4x256xf32>
    %85 = arith.mulf %77, %84 : vector<4x256xf32>
    %cst_26 = arith.constant dense<0.000000e+00> : vector<4xf32>
    %86 = vector.multi_reduction <add>, %85, %cst_26 [1] : vector<4x256xf32> to vector<4xf32>
    %87 = vector.shape_cast %86 : vector<4xf32> to vector<4x1xf32>
    %88 = tpu.reciprocal %79 {approx = true} : vector<4x1xf32> -> vector<4x1xf32>
    %89 = arith.mulf %79, %88 : vector<4x1xf32>
    %cst_27 = arith.constant 2.000000e+00 : f32
    %90 = vector.broadcast %cst_27 : f32 to vector<4x1xf32>
    %91 = arith.subf %90, %89 : vector<4x1xf32>
    %92 = arith.mulf %88, %91 : vector<4x1xf32>
    %93 = arith.mulf %83, %92 : vector<4x1xf32>
    %94 = arith.mulf %87, %92 : vector<4x1xf32>
    %95 = vector.broadcast %0 : vector<1x256xf32> to vector<4x256xf32>
    %96 = vector.broadcast %93 : vector<4x1xf32> to vector<4x256xf32>
    %97 = arith.subf %95, %96 : vector<4x256xf32>
    %98 = arith.mulf %97, %97 : vector<4x256xf32>
    %99 = vector.broadcast %1 : vector<1x256xf32> to vector<4x256xf32>
    %100 = vector.broadcast %94 : vector<4x1xf32> to vector<4x256xf32>
    %101 = arith.subf %99, %100 : vector<4x256xf32>
    %102 = arith.mulf %101, %101 : vector<4x256xf32>
    %103 = arith.addf %98, %102 : vector<4x256xf32>
    %cst_28 = arith.constant 1.000000e+02 : f32
    %104 = vector.broadcast %cst_28 : f32 to vector<4x256xf32>
    %105 = arith.mulf %103, %104 : vector<4x256xf32>
    %cst_29 = arith.constant 0.000000e+00 : f32
    %106 = vector.broadcast %cst_29 : f32 to vector<4x256xf32>
    %107 = arith.subf %106, %105 : vector<4x256xf32>
    %108 = math.exp %107 : vector<4x256xf32>
    %cst_30 = arith.constant 1.000000e+00 : f32
    %109 = vector.broadcast %cst_30 : f32 to vector<4x256xf32>
    %110 = arith.subf %109, %71 : vector<4x256xf32>
    %cst_31 = arith.constant 1.000000e+00 : f32
    %111 = vector.broadcast %cst_31 : f32 to vector<4x256xf32>
    %112 = arith.subf %111, %108 : vector<4x256xf32>
    %113 = arith.mulf %110, %112 : vector<4x256xf32>
    %114 = vector.extract_strided_slice %108 {offsets = [3, 0], sizes = [1, 256], strides = [1, 1]} : vector<4x256xf32> to vector<1x256xf32>
    %115 = vector.extract_strided_slice %113 {offsets = [3, 0], sizes = [1, 256], strides = [1, 1]} : vector<4x256xf32> to vector<1x256xf32>
    %116 = vector.extract_strided_slice %108 {offsets = [2, 0], sizes = [1, 256], strides = [1, 1]} : vector<4x256xf32> to vector<1x256xf32>
    %117 = arith.mulf %116, %115 : vector<1x256xf32>
    %118 = arith.addf %114, %117 : vector<1x256xf32>
    %119 = vector.extract_strided_slice %113 {offsets = [2, 0], sizes = [1, 256], strides = [1, 1]} : vector<4x256xf32> to vector<1x256xf32>
    %120 = arith.mulf %115, %119 : vector<1x256xf32>
    %121 = vector.extract_strided_slice %108 {offsets = [1, 0], sizes = [1, 256], strides = [1, 1]} : vector<4x256xf32> to vector<1x256xf32>
    %122 = arith.mulf %121, %120 : vector<1x256xf32>
    %123 = arith.addf %118, %122 : vector<1x256xf32>
    %124 = vector.extract_strided_slice %113 {offsets = [1, 0], sizes = [1, 256], strides = [1, 1]} : vector<4x256xf32> to vector<1x256xf32>
    %125 = arith.mulf %120, %124 : vector<1x256xf32>
    %126 = vector.extract_strided_slice %108 {offsets = [0, 0], sizes = [1, 256], strides = [1, 1]} : vector<4x256xf32> to vector<1x256xf32>
    %127 = arith.mulf %126, %125 : vector<1x256xf32>
    %128 = arith.addf %123, %127 : vector<1x256xf32>
    %129 = vector.extract_strided_slice %113 {offsets = [0, 0], sizes = [1, 256], strides = [1, 1]} : vector<4x256xf32> to vector<1x256xf32>
    %130 = arith.mulf %125, %129 : vector<1x256xf32>
    %131 = vector.broadcast %130 : vector<1x256xf32> to vector<8x256xf32>
    %132 = arith.mulf %33, %131 : vector<8x256xf32>
    %133 = vector.broadcast %128 : vector<1x256xf32> to vector<8x256xf32>
    %134 = arith.mulf %34, %133 : vector<8x256xf32>
    %135 = arith.addf %132, %134 : vector<8x256xf32>
    %c0_32 = arith.constant 0 : index
    %c0_33 = arith.constant 0 : index
    %c0_34 = arith.constant 0 : index
    %136 = vector.load %arg5[%c0_32, %c0_33, %c0_34] : memref<8x3x1xf32, #tpu.memory_space<vmem>>, vector<1x3x1xf32>
    %137 = vector.shape_cast %136 : vector<1x3x1xf32> to vector<3x1xf32>
    %138 = vector.extract_strided_slice %135 {offsets = [0, 0], sizes = [1, 256], strides = [1, 1]} : vector<8x256xf32> to vector<1x256xf32>
    %139 = vector.broadcast %137 : vector<3x1xf32> to vector<3x256xf32>
    %140 = vector.broadcast %138 : vector<1x256xf32> to vector<3x256xf32>
    %141 = arith.mulf %139, %140 : vector<3x256xf32>
    %142 = vector.broadcast %3 : vector<3x1xf32> to vector<3x256xf32>
    %143 = arith.addf %142, %141 : vector<3x256xf32>
    %c1_35 = arith.constant 1 : index
    %c0_36 = arith.constant 0 : index
    %c0_37 = arith.constant 0 : index
    %144 = vector.load %arg5[%c1_35, %c0_36, %c0_37] : memref<8x3x1xf32, #tpu.memory_space<vmem>>, vector<1x3x1xf32>
    %145 = vector.shape_cast %144 : vector<1x3x1xf32> to vector<3x1xf32>
    %146 = vector.extract_strided_slice %135 {offsets = [1, 0], sizes = [1, 256], strides = [1, 1]} : vector<8x256xf32> to vector<1x256xf32>
    %147 = vector.broadcast %145 : vector<3x1xf32> to vector<3x256xf32>
    %148 = vector.broadcast %146 : vector<1x256xf32> to vector<3x256xf32>
    %149 = arith.mulf %147, %148 : vector<3x256xf32>
    %150 = arith.addf %143, %149 : vector<3x256xf32>
    %c2_38 = arith.constant 2 : index
    %c0_39 = arith.constant 0 : index
    %c0_40 = arith.constant 0 : index
    %151 = vector.load %arg5[%c2_38, %c0_39, %c0_40] : memref<8x3x1xf32, #tpu.memory_space<vmem>>, vector<1x3x1xf32>
    %152 = vector.shape_cast %151 : vector<1x3x1xf32> to vector<3x1xf32>
    %153 = vector.extract_strided_slice %135 {offsets = [2, 0], sizes = [1, 256], strides = [1, 1]} : vector<8x256xf32> to vector<1x256xf32>
    %154 = vector.broadcast %152 : vector<3x1xf32> to vector<3x256xf32>
    %155 = vector.broadcast %153 : vector<1x256xf32> to vector<3x256xf32>
    %156 = arith.mulf %154, %155 : vector<3x256xf32>
    %157 = arith.addf %150, %156 : vector<3x256xf32>
    %c3 = arith.constant 3 : index
    %c0_41 = arith.constant 0 : index
    %c0_42 = arith.constant 0 : index
    %158 = vector.load %arg5[%c3, %c0_41, %c0_42] : memref<8x3x1xf32, #tpu.memory_space<vmem>>, vector<1x3x1xf32>
    %159 = vector.shape_cast %158 : vector<1x3x1xf32> to vector<3x1xf32>
    %160 = vector.extract_strided_slice %135 {offsets = [3, 0], sizes = [1, 256], strides = [1, 1]} : vector<8x256xf32> to vector<1x256xf32>
    %161 = vector.broadcast %159 : vector<3x1xf32> to vector<3x256xf32>
    %162 = vector.broadcast %160 : vector<1x256xf32> to vector<3x256xf32>
    %163 = arith.mulf %161, %162 : vector<3x256xf32>
    %164 = arith.addf %157, %163 : vector<3x256xf32>
    %c4 = arith.constant 4 : index
    %c0_43 = arith.constant 0 : index
    %c0_44 = arith.constant 0 : index
    %165 = vector.load %arg5[%c4, %c0_43, %c0_44] : memref<8x3x1xf32, #tpu.memory_space<vmem>>, vector<1x3x1xf32>
    %166 = vector.shape_cast %165 : vector<1x3x1xf32> to vector<3x1xf32>
    %167 = vector.extract_strided_slice %135 {offsets = [4, 0], sizes = [1, 256], strides = [1, 1]} : vector<8x256xf32> to vector<1x256xf32>
    %168 = vector.broadcast %166 : vector<3x1xf32> to vector<3x256xf32>
    %169 = vector.broadcast %167 : vector<1x256xf32> to vector<3x256xf32>
    %170 = arith.mulf %168, %169 : vector<3x256xf32>
    %171 = arith.addf %164, %170 : vector<3x256xf32>
    %c5 = arith.constant 5 : index
    %c0_45 = arith.constant 0 : index
    %c0_46 = arith.constant 0 : index
    %172 = vector.load %arg5[%c5, %c0_45, %c0_46] : memref<8x3x1xf32, #tpu.memory_space<vmem>>, vector<1x3x1xf32>
    %173 = vector.shape_cast %172 : vector<1x3x1xf32> to vector<3x1xf32>
    %174 = vector.extract_strided_slice %135 {offsets = [5, 0], sizes = [1, 256], strides = [1, 1]} : vector<8x256xf32> to vector<1x256xf32>
    %175 = vector.broadcast %173 : vector<3x1xf32> to vector<3x256xf32>
    %176 = vector.broadcast %174 : vector<1x256xf32> to vector<3x256xf32>
    %177 = arith.mulf %175, %176 : vector<3x256xf32>
    %178 = arith.addf %171, %177 : vector<3x256xf32>
    %c6 = arith.constant 6 : index
    %c0_47 = arith.constant 0 : index
    %c0_48 = arith.constant 0 : index
    %179 = vector.load %arg5[%c6, %c0_47, %c0_48] : memref<8x3x1xf32, #tpu.memory_space<vmem>>, vector<1x3x1xf32>
    %180 = vector.shape_cast %179 : vector<1x3x1xf32> to vector<3x1xf32>
    %181 = vector.extract_strided_slice %135 {offsets = [6, 0], sizes = [1, 256], strides = [1, 1]} : vector<8x256xf32> to vector<1x256xf32>
    %182 = vector.broadcast %180 : vector<3x1xf32> to vector<3x256xf32>
    %183 = vector.broadcast %181 : vector<1x256xf32> to vector<3x256xf32>
    %184 = arith.mulf %182, %183 : vector<3x256xf32>
    %185 = arith.addf %178, %184 : vector<3x256xf32>
    %c7 = arith.constant 7 : index
    %c0_49 = arith.constant 0 : index
    %c0_50 = arith.constant 0 : index
    %186 = vector.load %arg5[%c7, %c0_49, %c0_50] : memref<8x3x1xf32, #tpu.memory_space<vmem>>, vector<1x3x1xf32>
    %187 = vector.shape_cast %186 : vector<1x3x1xf32> to vector<3x1xf32>
    %188 = vector.extract_strided_slice %135 {offsets = [7, 0], sizes = [1, 256], strides = [1, 1]} : vector<8x256xf32> to vector<1x256xf32>
    %189 = vector.broadcast %187 : vector<3x1xf32> to vector<3x256xf32>
    %190 = vector.broadcast %188 : vector<1x256xf32> to vector<3x256xf32>
    %191 = arith.mulf %189, %190 : vector<3x256xf32>
    %192 = arith.addf %185, %191 : vector<3x256xf32>
    %193 = arith.index_cast %c0_i32 : i32 to index
    %c0_51 = arith.constant 0 : index
    %c0_52 = arith.constant 0 : index
    %194 = vector.load %arg7[%193, %c0_51, %c0_52] : memref<1x3x256xf32, #tpu.memory_space<vmem>>, vector<1x3x256xf32>
    %195 = vector.shape_cast %194 : vector<1x3x256xf32> to vector<3x256xf32>
    %196 = vector.shape_cast %192 : vector<3x256xf32> to vector<1x3x256xf32>
    tpu.vector_store %arg7[%193, %c0_51, %c0_52], %196 {strides = array<i32>} : memref<1x3x256xf32, #tpu.memory_space<vmem>>, vector<1x3x256xf32>,
    %c1_i32 = arith.constant 1 : i32
    return
  }
  func.func @transform_0(%arg0: i32) -> (i32, i32) {
    %c0_i32 = arith.constant 0 : i32
    %c0_i32_0 = arith.constant 0 : i32
    %c0_i32_1 = arith.constant 0 : i32
    return %c0_i32, %c0_i32_0 : i32, i32
  }
  func.func @transform_1(%arg0: i32) -> (i32, i32, i32) {
    %c0_i32 = arith.constant 0 : i32
    %c0_i32_0 = arith.constant 0 : i32
    %c0_i32_1 = arith.constant 0 : i32
    return %arg0, %c0_i32, %c0_i32_0 : i32, i32, i32
  }
  func.func @transform_2(%arg0: i32) -> (i32, i32, i32) {
    %c0_i32 = arith.constant 0 : i32
    %c0_i32_0 = arith.constant 0 : i32
    %c0_i32_1 = arith.constant 0 : i32
    %c0_i32_2 = arith.constant 0 : i32
    return %c0_i32, %c0_i32_0, %c0_i32_1 : i32, i32, i32
  }
  func.func @transform_3(%arg0: i32) -> (i32, i32) {
    %c0_i32 = arith.constant 0 : i32
    %c0_i32_0 = arith.constant 0 : i32
    %c0_i32_1 = arith.constant 0 : i32
    return %c0_i32, %c0_i32_0 : i32, i32
  }
  func.func @transform_4(%arg0: i32) -> (i32, i32, i32) {
    %c0_i32 = arith.constant 0 : i32
    %c0_i32_0 = arith.constant 0 : i32
    %c0_i32_1 = arith.constant 0 : i32
    %c0_i32_2 = arith.constant 0 : i32
    return %c0_i32, %c0_i32_0, %c0_i32_1 : i32, i32, i32
  }
  func.func @transform_5(%arg0: i32) -> (i32, i32) {
    %c0_i32 = arith.constant 0 : i32
    %c0_i32_0 = arith.constant 0 : i32
    %c0_i32_1 = arith.constant 0 : i32
    return %c0_i32, %c0_i32_0 : i32, i32
  }
  func.func @transform_6(%arg0: i32) -> (i32, i32, i32) {
    %c0_i32 = arith.constant 0 : i32
    %c0_i32_0 = arith.constant 0 : i32
    %c0_i32_1 = arith.constant 0 : i32
    return %arg0, %c0_i32, %c0_i32_0 : i32, i32, i32
  }
}

</mosaic_0001>

<bundles_post_ra>
// kernel: tile.9
= control target key start
LH: loop header
LB: loop body
LE: loop exit
PB: predicated region body
PF: predicated region fallthrough
CT: control target
= control target key end

     0   :  { %s7_s6 = smov 3  ;;  %s21_s9 = smov 3  ;;  %vm4_vm0 = vcmask 130048   ;;  %vm11_vm1 = vcmask 1048448   ;;  %vm18_vm2 = vcmask 917248   ;;  %vm25_vm3 = vcmask 786048   ;;  %s131_s0 = inlined_call_operand.vmem [shape: f32[16,16], index: 0, kind: input, shape index: {}]   ;;  %s132_s1 = inlined_call_operand.vmem [shape: f32[1,256], index: 1, kind: output, shape index: {}]  }
   0x1   :  { %v69_v0 = vld [vmem:[%s131_s0 + $0x7] ss:$8 sm:%s7_s6]   ;;  %s84_s10 = smov 112   ;;  %v71_v1 = vld [vmem:[%s131_s0 + $0x5] ss:$8 sm:%s21_s9]   ;;  %s14_s13 = smov 3 }
   0x2   :  { %9 = vrot.lane.b32.xlu0 %v69_v0, %s84_s10  ;;  %s85_s14 = smov 80   ;;  %v70_v2 = vld [vmem:[%s131_s0 + $0x6] ss:$8 sm:%s14_s13]   ;;  %s28_s17 = smov 3  ;;  %vm32_vm4 = vcmask 654848   ;;  %vm39_vm5 = vcmask 523648  }
   0x3   :  { %23 = vrot.lane.b32.xlu1 %v71_v1, %s85_s14  ;;  %v72_v3 = vld [vmem:[%s131_s0 + $0x4] ss:$8 sm:%s28_s17]   ;;  %s35_s20 = smov 3  ;;  %s42_s21 = smov 3  ;;  %vm46_vm6 = vcmask 392448   ;;  %vm53_vm7 = vcmask 261248  }
   0x4   :  { %s86_s22 = smov 96   ;;  %s87_s23 = smov 64   ;;  %v73_v4 = vld [vmem:[%s131_s0 + $0x3] ss:$8 sm:%s35_s20]   ;;  %v74_v5 = vld [vmem:[%s131_s0 + $0x2] ss:$8 sm:%s42_s21]  }
   0x5   :  { %s2_s26 = smov 3  ;;  %s49_s29 = smov 3 }
   0x6   :  { %16 = vrot.lane.b32.xlu0 %v70_v2, %s86_s22  ;;  %v3_v6 = vld [vmem:[%s131_s0] ss:$8 sm:%s2_s26]   ;;  %s88_s3 = smov 48   ;;  %s89_s4 = smov 32  }
   0x7   :  { %30 = vrot.lane.b32.xlu1 %v72_v3, %s87_s23  ;;  %5 = vst.msk [vmem:[#allocation0] ss:$8 sm:$0x3] %vm4_vm0, %v3_v6   ;;  %v75_v7 = vld [vmem:[%s131_s0 + $0x1] ss:$8 sm:%s49_s29]   ;;  %s90_s0 = smov 16  }
   0xa   :  { %37 = vrot.lane.b32.xlu0 %v73_v4, %s88_s3 }
   0xb   :  { %44 = vrot.lane.b32.xlu1 %v74_v5, %s89_s4 }
   0xe   :  { %51 = vrot.lane.b32.xlu0 %v75_v7, %s90_s0 }
  0x74   :  { %v10_v8 = vpop.permute.xlu0 %9  }
  0x75   :  { %12 = vst.msk [vmem:[#allocation0] ss:$8 sm:$0x3] %vm11_vm1, %v10_v8   ;;  %v24_v9 = vpop.permute.xlu1 %23  }
  0x78   :  { %v17_v10 = vpop.permute.xlu0 %16  }
  0x79   :  { %19 = vst.msk [vmem:[#allocation0] ss:$8 sm:$0x3] %vm18_vm2, %v17_v10   ;;  %v31_v11 = vpop.permute.xlu1 %30  }
  0x7a   :  { %26 = vst.msk [vmem:[#allocation0] ss:$8 sm:$0x3] %vm25_vm3, %v24_v9  }
  0x7b   :  { %33 = vst.msk [vmem:[#allocation0] ss:$8 sm:$0x3] %vm32_vm4, %v31_v11  }
  0x7c   :  { %v38_v12 = vpop.permute.xlu0 %37  }
  0x7d   :  { %40 = vst.msk [vmem:[#allocation0] ss:$8 sm:$0x3] %vm39_vm5, %v38_v12   ;;  %v45_v13 = vpop.permute.xlu1 %44  }
  0x7e   :  { %47 = vst.msk [vmem:[#allocation0] ss:$8 sm:$0x3] %vm46_vm6, %v45_v13  }
  0x80   :  { %v52_v14 = vpop.permute.xlu0 %51  }
  0x81   :  { %54 = vst.msk [vmem:[#allocation0] ss:$8 sm:$0x3] %vm53_vm7, %v52_v14  }
  0x88   :  { %v59_v15 = vld [vmem:[#allocation0] sm:$0x1]  ;;  %v64_v16 = vld [vmem:[#allocation0 + $0x8] sm:$0x1] }
  0x89   :  { %62 = vst [vmem:[%s132_s1] sm:$0x1] %v59_v15  ;;  %76 = vst [vmem:[%s132_s1 + $0x1] sm:$0x1] %v64_v16 }

// kernel: tile.8
= control target key start
LH: loop header
LB: loop body
LE: loop exit
PB: predicated region body
PF: predicated region fallthrough
CT: control target
= control target key end

     0   :  { %s28_s0 = inlined_call_operand.vmem [shape: f32[16], index: 0, kind: input, shape index: {}]   ;;  %s29_s1 = inlined_call_operand.vmem [shape: f32[16,16], index: 1, kind: output, shape index: {}]  }
   0x1   :  { %v4_v0 = vld [vmem:[%s28_s0] ss:$0 sm:$0xff] }
   0x2   :  { %5 = vst [vmem:[%s29_s1] sm:$0xff] %v4_v0  ;;  %8 = vst [vmem:[%s29_s1 + $0x8] sm:$0xff] %v4_v0 }

// kernel: transporter_forward.1
= control target key start
LH: loop header
LB: loop body
LE: loop exit
PB: predicated region body
PF: predicated region fallthrough
CT: control target
= control target key end

     0   :  { %s1011_s21 = smov 0   ;;  %s1247_s0 = inlined_call_operand.vmem [shape: f32[2,256], index: 0, kind: input, shape index: {}]   ;;  %s1248_s1 = inlined_call_operand.vmem [shape: f32[2,3,512], index: 1, kind: input, shape index: {}]   ;;  %s1249_s2 = inlined_call_operand.vmem [shape: f32[3,12,1], index: 2, kind: input, shape index: {}]   ;;  %s1250_s3 = inlined_call_operand.vmem [shape: f32[12,1], index: 3, kind: input, shape index: {}]   ;;  %s1251_s4 = inlined_call_operand.vmem [shape: f32[8,3,1], index: 4, kind: input, shape index: {}]   ;;  %s1252_s5 = inlined_call_operand.vmem [shape: f32[3,1], index: 5, kind: input, shape index: {}]   ;;  %s1253_s6 = inlined_call_operand.vmem [shape: f32[2,3,256], index: 6, kind: output, shape index: {}]  }
   0x1 LB: > { %s911_s22 = sadd.s32 4294967295, %s973_s21   ;;  %p915_p0 = scmp.ge.s32.totalorder %s973_s21, 1  ;;  %s973_s21 = sphi %s1011_s21, %s16_s21  }
   0x2   : > { %p212_p1 = scmp.lt.s32.totalorder %s973_s21, 3 }
   0x4   : > { %p213_p2 = pnand %p915_p0, %p212_p1 }
   0x5   : > { %p242_p3 = scmp.lt.s32.totalorder (!%p213_p2), %s911_s22, 1 }
   0x6   : > { %216 = sbr.rel (%p213_p2) target bundleno = 551 (0x227), region = 44 }
   0xb   : > { %v922_v0 = vld [vmem:[%s1249_s2 + $0x18] sm:$0xf]  ;;  %v261_v1 = vld [vmem:[%s1249_s2 + $0x8] sm:$0xf]  ;;  %v975_v2 = vmov 0   ;;  %s1255_s22 = smov (!%p242_p3, %s911_s22), 1  ;;  %v274_v5 = vlaneseq }
   0xc   : > { %946 = vset.pattern.permute.xlu1 %v975_v2  ;;  %945 = vset.pattern.permute.xlu0 %v975_v2  ;;  %v924_v3 = vld [vmem:[%s1249_s2 + $0x28] sm:$0xf]  ;;  %s934_s7 = sshll.u32 %s1255_s22, 4  ;;  %vm470_vm0 = vcmask 1043456   ;;  %s935_s19 = sshll.u32 %s1255_s22, 3 }
   0xd   : > { %346 = vperm.xlu1 %946, %v922_v0   ;;  %269 = vperm.xlu0 %945, %v261_v1   ;;  %v256_v4 = vld [vmem:[%s1250_s3 + $0x8] sm:$0xf]  ;;  %v1034_v6 = vshrl.u32 %v274_v5, 7  ;;  %s246_s10 = scalar_lea.vmem %s1248_s1, %s934_s7  ;;  %s251_s24 = scalar_lea.vmem %s1253_s6, %s935_s19 }
   0xe   : > { %v258_v11 = vld [vmem:[%s246_s10] sm:$0x77]  ;;  %v259_v12 = vld [vmem:[%s246_s10 + $0x8] sm:$0x77] }
   0xf   : > { %v1040_v7 = vsub.s32 0, %v1034_v6  ;;  %v1043_v8 = vsub.s32 4, %v1034_v6  ;;  %v1046_v9 = vsub.s32 1, %v1034_v6  ;;  %v1049_v10 = vsub.s32 5, %v1034_v6 }
  0x10   : > { %v1052_v13 = vsub.s32 2, %v1034_v6  ;;  %v1055_v14 = vsub.s32 6, %v1034_v6 }
  0x11   : > { %411 = vperm.xlu1 %946, %v924_v3   ;;  %325 = vperm.xlu0 %945, %v256_v4   ;;  %v277_v15 = vrot.slane %v258_v11, %v1040_v7  ;;  %v281_v16 = vrot.slane %v258_v11, %v1043_v8  ;;  %v285_v17 = vrot.slane %v259_v12, %v1040_v7 }
  0x12   : > { %v289_v18 = vrot.slane %v259_v12, %v1043_v8  ;;  %v352_v19 = vrot.slane %v258_v11, %v1046_v9  ;;  %v356_v20 = vrot.slane %v258_v11, %v1049_v10  ;;  %v360_v21 = vrot.slane %v259_v12, %v1046_v9 }
  0x13   : > { %v364_v22 = vrot.slane %v259_v12, %v1049_v10  ;;  %v417_v23 = vrot.slane %v258_v11, %v1052_v13  ;;  %v421_v24 = vrot.slane %v258_v11, %v1055_v14  ;;  %v425_v25 = vrot.slane %v259_v12, %v1052_v13 }
  0x14   : > { %v429_v26 = vrot.slane %v259_v12, %v1055_v14  ;;  %v1070_v29 = vrot.slane %v277_v15, %v1040_v7  ;;  %v1073_v30 = vrot.slane %v281_v16, %v1040_v7  ;;  %v1076_v31 = vrot.slane %v285_v17, %v1040_v7 }
  0x15   : > { %v1079_v32 = vrot.slane %v289_v18, %v1040_v7  ;;  %v1082_v33 = vrot.slane %v352_v19, %v1046_v9  ;;  %v1085_v34 = vrot.slane %v356_v20, %v1046_v9  ;;  %v1088_v35 = vrot.slane %v360_v21, %v1046_v9 }
  0x16   : > { %v1091_v36 = vrot.slane %v364_v22, %v1046_v9  ;;  %v1094_v37 = vrot.slane %v417_v23, %v1052_v13  ;;  %v1097_v38 = vrot.slane %v421_v24, %v1052_v13  ;;  %v1100_v39 = vrot.slane %v425_v25, %v1052_v13 }
  0x17   : > { %v1103_v40 = vrot.slane %v429_v26, %v1052_v13  ;;  %v252_v26 = vld [vmem:[%s1247_s0] ss:$2 sm:$0x3] }
  0x88   : > { %v347_v27 = vpop.permute.xlu1 %346  ;;  %v270_v28 = vpop.permute.xlu0 %269 }
  0x89   : > { %v314_v41 = vmul.f32 %v1070_v29, %v270_v28  ;;  %v315_v42 = vmul.f32 %v1073_v30, %v270_v28  ;;  %v316_v43 = vmul.f32 %v1076_v31, %v270_v28  ;;  %v317_v44 = vmul.f32 %v1079_v32, %v270_v28  ;;  %v920_v28 = vld [vmem:[%s1247_s0 + $0x1] ss:$2 sm:$0x3] }
  0x8a   : > { %v389_v47 = vmul.f32 %v1082_v33, %v347_v27  ;;  %v390_v48 = vmul.f32 %v1085_v34, %v347_v27  ;;  %v391_v49 = vmul.f32 %v1088_v35, %v347_v27  ;;  %v392_v50 = vmul.f32 %v1091_v36, %v347_v27 }
  0x8b   : > { %v1125_v27 = vrot.slane %v252_v26, %v1040_v7 }
  0x8c   : > { %v412_v45 = vpop.permute.xlu1 %411  ;;  %v326_v46 = vpop.permute.xlu0 %325 }
  0x8d   : > { %v332_v51 = vadd.f32 %v326_v46, %v314_v41  ;;  %v333_v52 = vadd.f32 %v326_v46, %v315_v42  ;;  %v334_v53 = vadd.f32 %v326_v46, %v316_v43  ;;  %v335_v54 = vadd.f32 %v326_v46, %v317_v44 }
  0x8e   : > { %v454_v55 = vmul.f32 %v1094_v37, %v412_v45  ;;  %v455_v56 = vmul.f32 %v1097_v38, %v412_v45  ;;  %v456_v57 = vmul.f32 %v1100_v39, %v412_v45  ;;  %v457_v58 = vmul.f32 %v1103_v40, %v412_v45 }
  0x8f   : > { %v399_v59 = vadd.f32 %v391_v49, %v334_v53  ;;  %v400_v60 = vadd.f32 %v392_v50, %v335_v54  ;;  %v397_v61 = vadd.f32 %v389_v47, %v332_v51  ;;  %v398_v62 = vadd.f32 %v390_v48, %v333_v52 }
  0x90   : > { %v1131_v42 = vrot.slane %v252_v26, %v1046_v9  ;;  %v1134_v45 = vrot.slane %v920_v28, %v1040_v7  ;;  %v1137_v46 = vrot.slane %v920_v28, %v1046_v9  ;;  %v927_v26 = vld [vmem:[%s1251_s4 + $0xc] sm:$0x7]  ;;  %v930_v28 = vld [vmem:[%s1251_s4 + $0x18] sm:$0x7] }
  0x91   : > { %v464_v63 = vadd.f32 %v456_v57, %v399_v59  ;;  %v465_v0 = vadd.f32 %v457_v58, %v400_v60  ;;  %v462_v1 = vadd.f32 %v454_v55, %v397_v61  ;;  %v463_v2 = vadd.f32 %v455_v56, %v398_v62 }
  0x93   : > { %v547_v3 = vsel %vm470_vm0, %v464_v63, -inf  ;;  %v548_v4 = vsel %vm470_vm0, %v465_v0, -inf  ;;  %v471_v5 = vsel %vm470_vm0, %v462_v1, -inf  ;;  %v472_v11 = vsel %vm470_vm0, %v463_v2, -inf }
  0x94   : > { %v549_v12 = vmax.f32 %v547_v3, %v548_v4  ;;  %v473_v15 = vmax.f32 %v471_v5, %v472_v11 }
  0x96   : > { %550 = vmax.xlane.f32.xlu1 %v549_v12  ;;  %474 = vmax.xlane.f32.xlu0 %v473_v15 }
 0x11f   : > { %v551_v16 = vpop.xlane.xlu1 %550  ;;  %v475_v17 = vpop.xlane.xlu0 %474 }
 0x120   : > { %v552_v18 = vsub.f32 %v464_v63, %v551_v16  ;;  %v553_v19 = vsub.f32 %v465_v0, %v551_v16  ;;  %v476_v20 = vsub.f32 %v462_v1, %v475_v17  ;;  %v477_v21 = vsub.f32 %v463_v2, %v475_v17  ;;  %v260_v17 = vld [vmem:[%s1249_s2] sm:$0xff] }
 0x122   : > { %v554_v22 = vmul.f32 1.442695, %v552_v18  ;;  %v556_v23 = vmul.f32 1.442695, %v553_v19  ;;  %v478_v24 = vmul.f32 1.442695, %v476_v20 }
 0x123   : > { %v480_v25 = vmul.f32 1.442695, %v477_v21  ;;  %v921_v18 = vld [vmem:[%s1249_s2 + $0x10] sm:$0xff]  ;;  %v923_v19 = vld [vmem:[%s1249_s2 + $0x20] sm:$0xff] }
 0x124   : > { %947 = vpow2.f32 %v554_v22  ;;  %v255_v20 = vld [vmem:[%s1250_s3] sm:$0xff] }
 0x125   : > { %949 = vpow2.f32 %v556_v23  ;;  %v257_v21 = vld [vmem:[%s1252_s5] sm:$0x7]  ;;  %v926_v23 = vld [vmem:[%s1251_s4 + $0x8] sm:$0x7] }
 0x126   : > { %951 = vpow2.f32 %v478_v24  ;;  %v695_v22 = vld [vmem:[%s1251_s4] sm:$0x7]  ;;  %v925_v24 = vld [vmem:[%s1251_s4 + $0x4] sm:$0x7] }
 0x127   : > { %953 = vpow2.f32 %v480_v25  ;;  %v928_v25 = vld [vmem:[%s1251_s4 + $0x10] sm:$0x7] }
 0x131   : > { %v948_v41 = vpop.eup %947 }
 0x132   : > { %v950_v43 = vpop.eup %949  ;;  %v563_v52 = vmul.f32 %v948_v41, %v1125_v27  ;;  %v558_v56 = vsel %vm470_vm0, %v948_v41, 0.0  ;;  %v570_v3 = vmul.f32 %v948_v41, %v1134_v45  ;;  %v929_v41 = vld [vmem:[%s1251_s4 + $0x14] sm:$0x7] }
 0x133   : > { %v952_v44 = vpop.eup %951  ;;  %v564_v53 = vmul.f32 %v950_v43, %v1131_v42  ;;  %v559_v58 = vsel %vm470_vm0, %v950_v43, 0.0  ;;  %v571_v4 = vmul.f32 %v950_v43, %v1137_v46  ;;  %v931_v43 = vld [vmem:[%s1251_s4 + $0x1c] sm:$0x7] }
 0x134   : > { %v954_v47 = vpop.eup %953  ;;  %v482_v48 = vsel %vm470_vm0, %v952_v44, 0.0  ;;  %v498_v49 = vmul.f32 %v952_v44, %v1125_v27  ;;  %v516_v59 = vmul.f32 %v952_v44, %v1134_v45  ;;  %v565_v62 = vsel %vm470_vm0, %v563_v52, 0.0 }
 0x135   : > { %v483_v50 = vsel %vm470_vm0, %v954_v47, 0.0  ;;  %v499_v51 = vmul.f32 %v954_v47, %v1131_v42  ;;  %v517_v60 = vmul.f32 %v954_v47, %v1137_v46  ;;  %v566_v63 = vsel %vm470_vm0, %v564_v53, 0.0 }
 0x136   : > { %v484_v54 = vadd.f32 %v483_v50, %v482_v48  ;;  %v500_v55 = vsel %vm470_vm0, %v498_v49, 0.0  ;;  %v560_v0 = vadd.f32 %v559_v58, %v558_v56  ;;  %v518_v1 = vsel %vm470_vm0, %v516_v59, 0.0 }
 0x137   : > { %v501_v57 = vsel %vm470_vm0, %v499_v51, 0.0  ;;  %v519_v2 = vsel %vm470_vm0, %v517_v60, 0.0  ;;  %v567_v5 = vadd.f32 %v566_v63, %v565_v62  ;;  %v572_v12 = vsel %vm470_vm0, %v570_v3, 0.0 }
 0x138   : > { %485 = vadd.xlane.f32.xlu0 %v484_v54  ;;  %v502_v61 = vadd.f32 %v501_v57, %v500_v55  ;;  %v520_v11 = vadd.f32 %v519_v2, %v518_v1  ;;  %v573_v15 = vsel %vm470_vm0, %v571_v4, 0.0 }
 0x139   : > { %v574_v16 = vadd.f32 %v573_v15, %v572_v12 }
 0x13a   : > { %503 = vadd.xlane.f32.xlu1 %v502_v61 }
 0x13c   : > { %561 = vadd.xlane.f32.xlu0 %v560_v0 }
 0x13e   : > { %568 = vadd.xlane.f32.xlu1 %v567_v5 }
 0x140   : > { %521 = vadd.xlane.f32.xlu0 %v520_v11 }
 0x144   : > { %575 = vadd.xlane.f32.xlu0 %v574_v16 }
 0x14f   : > { %264 = vperm.xlu1 %946, %v260_v17  }
 0x153   : > { %341 = vperm.xlu1 %946, %v921_v18  }
 0x157   : > { %406 = vperm.xlu1 %946, %v923_v19  }
 0x15a   : > { %320 = vperm.xlu0 %945, %v255_v20  }
 0x15b   : > { %713 = vperm.xlu1 %946, %v257_v21  }
 0x15e   : > { %698 = vperm.xlu0 %945, %v695_v22  }
 0x15f   : > { %741 = vperm.xlu1 %946, %v926_v23  }
 0x162   : > { %722 = vperm.xlu0 %945, %v925_v24  }
 0x163   : > { %779 = vperm.xlu1 %946, %v928_v25  }
 0x166   : > { %760 = vperm.xlu0 %945, %v927_v26  }
 0x167   : > { %817 = vperm.xlu1 %946, %v930_v28  }
 0x16a   : > { %798 = vperm.xlu0 %945, %v929_v41  }
 0x16e   : > { %836 = vperm.xlu0 %945, %v931_v43  }
 0x1c1   : > { %v486_v44 = vpop.xlane.xlu0 %485 }
 0x1c2   : > { %955 = vrcp.f32 %v486_v44 }
 0x1c3   : > { %v504_v52 = vpop.xlane.xlu1 %503 }
 0x1c5   : > { %v562_v47 = vpop.xlane.xlu0 %561 }
 0x1c6   : > { %957 = vrcp.f32 %v562_v47 }
 0x1c7   : > { %v569_v63 = vpop.xlane.xlu1 %568 }
 0x1c9   : > { %v522_v55 = vpop.xlane.xlu0 %521 }
 0x1cd   : > { %v576_v5 = vpop.xlane.xlu0 %575 }
 0x1cf   : > { %v956_v48 = vpop.eup %955 }
 0x1d0   : > { %v524_v49 = vmul.f32 %v956_v48, %v486_v44 }
 0x1d2   : > { %v525_v50 = vsub.f32 2.0, %v524_v49 }
 0x1d3   : > { %v958_v51 = vpop.eup %957 }
 0x1d4   : > { %v526_v53 = vmul.f32 %v956_v48, %v525_v50  ;;  %v578_v54 = vmul.f32 %v958_v51, %v562_v47 }
 0x1d6   : > { %v527_v56 = vmul.f32 %v526_v53, %v504_v52  ;;  %v579_v57 = vsub.f32 2.0, %v578_v54  ;;  %v528_v58 = vmul.f32 %v526_v53, %v522_v55 }
 0x1d8   : > { %v529_v59 = vsub.f32 %v1125_v27, %v527_v56  ;;  %v530_v60 = vsub.f32 %v1131_v42, %v527_v56  ;;  %v580_v61 = vmul.f32 %v958_v51, %v579_v57  ;;  %v533_v62 = vsub.f32 %v1134_v45, %v528_v58 }
 0x1d9   : > { %v534_v0 = vsub.f32 %v1137_v46, %v528_v58  ;;  %v1207_v56 = vsub.s32 3, %v1034_v6 }
 0x1da   : > { %v531_v1 = vmul.f32 %v529_v59, %v529_v59  ;;  %v532_v2 = vmul.f32 %v530_v60, %v530_v60  ;;  %v581_v3 = vmul.f32 %v580_v61, %v569_v63  ;;  %v535_v4 = vmul.f32 %v533_v62, %v533_v62 }
 0x1db   : > { %v536_v11 = vmul.f32 %v534_v0, %v534_v0  ;;  %v582_v12 = vmul.f32 %v580_v61, %v576_v5 }
 0x1dc   : > { %v583_v15 = vsub.f32 %v1125_v27, %v581_v3  ;;  %v584_v16 = vsub.f32 %v1131_v42, %v581_v3  ;;  %v537_v17 = vadd.f32 %v535_v4, %v531_v1  ;;  %v321_v3 = vpop.permute.xlu0 %320 }
 0x1dd   : > { %v538_v18 = vadd.f32 %v536_v11, %v532_v2  ;;  %v587_v19 = vsub.f32 %v1134_v45, %v582_v12  ;;  %v588_v20 = vsub.f32 %v1137_v46, %v582_v12  ;;  %v265_v46 = vpop.permute.xlu1 %264 }
 0x1de   : > { %v585_v21 = vmul.f32 %v583_v15, %v583_v15  ;;  %v586_v22 = vmul.f32 %v584_v16, %v584_v16  ;;  %v539_v23 = vmul.f32 100.0, %v537_v17  ;;  %v310_v59 = vmul.f32 %v1070_v29, %v265_v46 }
 0x1df   : > { %v540_v24 = vmul.f32 100.0, %v538_v18  ;;  %v589_v25 = vmul.f32 %v587_v19, %v587_v19  ;;  %v590_v26 = vmul.f32 %v588_v20, %v588_v20  ;;  %v311_v60 = vmul.f32 %v1073_v30, %v265_v46 }
 0x1e0   : > { %v541_v28 = vsub.f32 0.0, %v539_v23  ;;  %v312_v0 = vmul.f32 %v1076_v31, %v265_v46  ;;  %v313_v1 = vmul.f32 %v1079_v32, %v265_v46  ;;  %v328_v18 = vadd.f32 %v321_v3, %v310_v59 }
 0x1e1   : > { %v542_v41 = vsub.f32 0.0, %v540_v24  ;;  %v591_v43 = vadd.f32 %v589_v25, %v585_v21  ;;  %v592_v44 = vadd.f32 %v590_v26, %v586_v22  ;;  %v342_v52 = vpop.permute.xlu1 %341 }
 0x1e2   : > { %v543_v47 = vmul.f32 1.442695, %v541_v28  ;;  %v385_v4 = vmul.f32 %v1082_v33, %v342_v52  ;;  %v386_v5 = vmul.f32 %v1085_v34, %v342_v52  ;;  %v387_v11 = vmul.f32 %v1088_v35, %v342_v52 }
 0x1e3   : > { %v593_v27 = vmul.f32 100.0, %v591_v43  ;;  %v594_v48 = vmul.f32 100.0, %v592_v44  ;;  %v545_v42 = vmul.f32 1.442695, %v542_v41  ;;  %v388_v29 = vmul.f32 %v1091_v36, %v342_v52 }
 0x1e4   : > { %959 = vpow2.f32 %v543_v47  ;;  %v329_v34 = vadd.f32 %v321_v3, %v311_v60  ;;  %v330_v23 = vadd.f32 %v321_v3, %v312_v0  ;;  %v331_v25 = vadd.f32 %v321_v3, %v313_v1 }
 0x1e5   : > { %v595_v49 = vsub.f32 0.0, %v593_v27  ;;  %v596_v50 = vsub.f32 0.0, %v594_v48  ;;  %961 = vpow2.f32 %v545_v42  ;;  %v407_v61 = vpop.permute.xlu1 %406 }
 0x1e6   : > { %v450_v30 = vmul.f32 %v1094_v37, %v407_v61  ;;  %v451_v15 = vmul.f32 %v1097_v38, %v407_v61  ;;  %v452_v31 = vmul.f32 %v1100_v39, %v407_v61  ;;  %v453_v19 = vmul.f32 %v1103_v40, %v407_v61 }
 0x1e7   : > { %v597_v45 = vmul.f32 1.442695, %v595_v49  ;;  %v599_v51 = vmul.f32 1.442695, %v596_v50  ;;  %v393_v39 = vadd.f32 %v385_v4, %v328_v18  ;;  %v394_v47 = vadd.f32 %v386_v5, %v329_v34 }
 0x1e8   : > { %v395_v42 = vadd.f32 %v387_v11, %v330_v23  ;;  %v699_v11 = vpop.permute.xlu0 %698 }
 0x1e9   : > { %963 = vpow2.f32 %v597_v45  ;;  %v458_v0 = vadd.f32 %v450_v30, %v393_v39  ;;  %v459_v4 = vadd.f32 %v451_v15, %v394_v47 }
 0x1ea   : > { %965 = vpow2.f32 %v599_v51  ;;  %v396_v51 = vadd.f32 %v388_v29, %v331_v25  ;;  %v460_v1 = vadd.f32 %v452_v31, %v395_v42  ;;  %v714_v31 = vpop.permute.xlu1 %713 }
 0x1ec   : > { %v461_v5 = vadd.f32 %v453_v19, %v396_v51 }
 0x1ee   : > { %v469_v30 = vmax.f32 %v461_v5, 0.0 }
 0x1f1   : > { %v960_v53 = vpop.eup %959 }
 0x1f2   : > { %v962_v54 = vpop.eup %961  ;;  %v601_v58 = vsub.f32 1.0, %v960_v53 }
 0x1f3   : > { %v602_v63 = vsub.f32 1.0, %v962_v54 }
 0x1f6   : > { %v964_v55 = vpop.eup %963 }
 0x1f7   : > { %v966_v57 = vpop.eup %965  ;;  %v603_v62 = vsub.f32 1.0, %v964_v55 }
 0x1f8   : > { %v604_v2 = vsub.f32 1.0, %v966_v57 }
 0x1f9   : > { %v605_v12 = vmul.f32 %v603_v62, %v601_v58 }
 0x1fa   : > { %v606_v16 = vmul.f32 %v604_v2, %v602_v63 }
 0x1fb   : > { %v609_v17 = vrot.slane %v605_v12, 1  ;;  %v623_v32 = vrot.slane %v605_v12, 7  ;;  %v645_v22 = vrot.slane %v605_v12, 6  ;;  %v667_v48 = vrot.slane %v605_v12, 5 }
 0x1fc   : > { %v610_v33 = vrot.slane %v606_v16, 1  ;;  %v624_v20 = vrot.slane %v606_v16, 7  ;;  %v646_v37 = vrot.slane %v606_v16, 6  ;;  %v668_v45 = vrot.slane %v606_v16, 5 }
 0x1fd   : > { %v613_v21 = vmul.f32 %v964_v55, %v609_v17  ;;  %v627_v35 = vmul.f32 %v623_v32, %v605_v12  ;;  %v466_v32 = vmax.f32 %v458_v0, 0.0 }
 0x1fe   : > { %v614_v36 = vmul.f32 %v966_v57, %v610_v33  ;;  %v628_v24 = vmul.f32 %v624_v20, %v606_v16  ;;  %v467_v33 = vmax.f32 %v459_v4, 0.0 }
 0x1ff   : > { %v617_v38 = vrot.slane %v613_v21, 7  ;;  %v631_v26 = vrot.slane %v627_v35, 2  ;;  %v649_v28 = vmul.f32 %v645_v22, %v627_v35  ;;  %v723_v21 = vpop.permute.xlu0 %722 }
 0x200   : > { %v618_v41 = vrot.slane %v614_v36, 7  ;;  %v632_v43 = vrot.slane %v628_v24, 2  ;;  %v650_v44 = vmul.f32 %v646_v37, %v628_v24  ;;  %v742_v37 = vpop.permute.xlu1 %741 }
 0x201   : > { %v635_v40 = vmul.f32 %v964_v55, %v631_v26  ;;  %v653_v27 = vrot.slane %v649_v28, 3  ;;  %v621_v46 = vadd.f32 %v964_v55, %v617_v38  ;;  %v671_v54 = vmul.f32 %v667_v48, %v649_v28 }
 0x202   : > { %v636_v49 = vmul.f32 %v966_v57, %v632_v43  ;;  %v654_v50 = vrot.slane %v650_v44, 3  ;;  %v622_v58 = vadd.f32 %v966_v57, %v618_v41  ;;  %v672_v61 = vmul.f32 %v668_v45, %v650_v44 }
 0x203   : > { %v639_v52 = vrot.slane %v635_v40, 6  ;;  %v657_v53 = vmul.f32 %v964_v55, %v653_v27  ;;  %v676_v29 = vrot.slane %v671_v54, %v1207_v56  ;;  %v761_v41 = vpop.permute.xlu0 %760 }
 0x204   : > { %v640_v59 = vrot.slane %v636_v49, 6  ;;  %v658_v60 = vmul.f32 %v966_v57, %v654_v50  ;;  %v680_v55 = vrot.slane %v672_v61, %v1207_v56  ;;  %v468_v57 = vmax.f32 %v460_v1, 0.0  ;;  %v780_v45 = vpop.permute.xlu1 %779 }
 0x205   : > { %v643_v62 = vadd.f32 %v639_v52, %v621_v46  ;;  %v661_v63 = vrot.slane %v657_v53, 5  ;;  %v681_v20 = vmul.f32 %v676_v29, %v466_v32  ;;  %v841_v53 = vsub.s32 7, %v1034_v6 }
 0x206   : > { %v644_v2 = vadd.f32 %v640_v59, %v622_v58  ;;  %v662_v3 = vrot.slane %v658_v60, 5  ;;  %v682_v15 = vmul.f32 %v680_v55, %v467_v33 }
 0x207   : > { %v665_v12 = vadd.f32 %v661_v63, %v643_v62 }
 0x208   : > { %v666_v16 = vadd.f32 %v662_v3, %v644_v2  ;;  %v818_v4 = vpop.permute.xlu1 %817 }
 0x209   : > { %v686_v17 = vrot.slane %v665_v12, %v1207_v56 }
 0x20a   : > { %v690_v18 = vrot.slane %v666_v16, %v1207_v56 }
 0x20b   : > { %v691_v34 = vmul.f32 %v686_v17, %v468_v57 }
 0x20c   : > { %v692_v19 = vmul.f32 %v690_v18, %v469_v30 }
 0x20d   : > { %v693_v35 = vadd.f32 %v691_v34, %v681_v20 }
 0x20e   : > { %v694_v22 = vadd.f32 %v692_v19, %v682_v15 }
 0x20f   : > { %v704_v23 = vrot.slane %v693_v35, %v1040_v7  ;;  %v728_v36 = vrot.slane %v693_v35, %v1046_v9  ;;  %v747_v26 = vrot.slane %v693_v35, %v1052_v13  ;;  %v766_v47 = vrot.slane %v693_v35, %v1207_v56 }
 0x210   : > { %v708_v24 = vrot.slane %v694_v22, %v1040_v7  ;;  %v732_v25 = vrot.slane %v694_v22, %v1046_v9  ;;  %v751_v39 = vrot.slane %v694_v22, %v1052_v13  ;;  %v770_v48 = vrot.slane %v694_v22, %v1207_v56  ;;  %v799_v56 = vpop.permute.xlu0 %798 }
 0x211   : > { %v709_v38 = vmul.f32 %v704_v23, %v699_v11  ;;  %v733_v44 = vmul.f32 %v728_v36, %v723_v21  ;;  %v752_v42 = vmul.f32 %v747_v26, %v742_v37  ;;  %v785_v49 = vrot.slane %v693_v35, %v1043_v8 }
 0x212   : > { %v710_v28 = vmul.f32 %v708_v24, %v699_v11  ;;  %v734_v27 = vmul.f32 %v732_v25, %v723_v21  ;;  %v753_v9 = vmul.f32 %v751_v39, %v742_v37  ;;  %v789_v51 = vrot.slane %v694_v22, %v1043_v8 }
 0x213   : > { %v716_v43 = vadd.f32 %v714_v31, %v709_v38  ;;  %v771_v13 = vmul.f32 %v766_v47, %v761_v41  ;;  %v804_v52 = vrot.slane %v693_v35, %v1049_v10  ;;  %v772_v58 = vmul.f32 %v770_v48, %v761_v41 }
 0x214   : > { %v717_v40 = vadd.f32 %v714_v31, %v710_v28  ;;  %v808_v59 = vrot.slane %v694_v22, %v1049_v10  ;;  %v790_v60 = vmul.f32 %v785_v49, %v780_v45  ;;  %v823_v62 = vrot.slane %v693_v35, %v1055_v14  ;;  %v837_v55 = vpop.permute.xlu0 %836 }
 0x215   : > { %v735_v7 = vadd.f32 %v733_v44, %v716_v43  ;;  %v791_v63 = vmul.f32 %v789_v51, %v780_v45  ;;  %v827_v8 = vrot.slane %v694_v22, %v1055_v14  ;;  %v809_v2 = vmul.f32 %v804_v52, %v799_v56 }
 0x216   : > { %v736_v50 = vadd.f32 %v734_v27, %v717_v40  ;;  %v842_v3 = vrot.slane %v693_v35, %v841_v53  ;;  %v810_v6 = vmul.f32 %v808_v59, %v799_v56  ;;  %v846_v11 = vrot.slane %v694_v22, %v841_v53 }
 0x217   : > { %v754_v46 = vadd.f32 %v752_v42, %v735_v7  ;;  %v828_v12 = vmul.f32 %v823_v62, %v818_v4  ;;  %v829_v10 = vmul.f32 %v827_v8, %v818_v4 }
 0x218   : > { %v755_v54 = vadd.f32 %v753_v9, %v736_v50  ;;  %v847_v32 = vmul.f32 %v842_v3, %v837_v55  ;;  %v848_v18 = vmul.f32 %v846_v11, %v837_v55 }
 0x219   : > { %v773_v61 = vadd.f32 %v771_v13, %v754_v46 }
 0x21a   : > { %v774_v0 = vadd.f32 %v772_v58, %v755_v54 }
 0x21b   : > { %v792_v1 = vadd.f32 %v790_v60, %v773_v61 }
 0x21c   : > { %v793_v5 = vadd.f32 %v791_v63, %v774_v0 }
 0x21d   : > { %v811_v29 = vadd.f32 %v809_v2, %v792_v1 }
 0x21e   : > { %v812_v16 = vadd.f32 %v810_v6, %v793_v5 }
 0x21f   : > { %v830_v17 = vadd.f32 %v828_v12, %v811_v29 }
 0x220   : > { %v831_v57 = vadd.f32 %v829_v10, %v812_v16 }
 0x221   : > { %v849_v33 = vadd.f32 %v847_v32, %v830_v17 }
 0x222   : > { %v850_v30 = vadd.f32 %v848_v18, %v831_v57 }
 0x224   : > { %v853_v14 = vcombine.low %v849_v33, %v850_v30 }
 0x226   : > { %855 = vst [vmem:[%s251_s24] sm:$0x77] %v853_v14 }
 0x227 PF: > { %s16_s21 = sadd.s32 1, %s973_s21  }
 0x228   : > { %p13_p4 = scmp.ge.s32.totalorder %s16_s21, 4  }
 0x22a   :  { %15 = sbr.rel (!%p13_p4) target bundleno = 1 (0x1), region = 84 }

</bundles_post_ra>
